<compile_context>
chip_gen: v5e
topology: v5e:2x2
jax: 0.10.0
libtpu: 0.0.40
codegen_flags: <defaults>
</compile_context>

<pallas_src>
import functools

import jax
import jax.numpy as jnp
from jax.experimental import pallas as pl
from jax.experimental.pallas import tpu as pltpu


def _round_up(v, m):
    return ((v + m - 1) // m) * m


def prepare_fc_params(weight, bias, *, param_dtype=jnp.bfloat16):
    """One-time (init-time) parameter transform.

    weight: [OUT, IN] (PyTorch nn.Linear layout)
    bias:   [OUT]
    Returns:
      w_t: [Kp, Np]  weight transposed to [IN, OUT], cast to param_dtype,
           zero-padded to 128-lane granularity.
      b:   [1, Np]   f32 bias, zero-padded.
    """
    OUT, IN = weight.shape
    Kp = _round_up(IN, 128)
    Np = _round_up(OUT, 128)
    w_t = jnp.asarray(weight).T.astype(param_dtype)          # [IN, OUT]
    if (Kp, Np) != (IN, OUT):
        w_t = jnp.pad(w_t, ((0, Kp - IN), (0, Np - OUT)))
    b = jnp.asarray(bias).astype(jnp.float32)
    if Np != OUT:
        b = jnp.pad(b, (0, Np - OUT))
    return w_t, b.reshape(1, Np)


# ------------------------------ kernels --------------------------------------


def _fc_onepass_kernel(x_ref, w_ref, b_ref, o_ref, *, compute_dtype):
    """Whole problem in one VMEM block: y = x @ w + b."""
    x = x_ref[...].astype(compute_dtype)
    w = w_ref[...].astype(compute_dtype)
    acc = jnp.dot(x, w, preferred_element_type=jnp.float32)
    o_ref[...] = (acc + b_ref[...]).astype(o_ref.dtype)


def _fc_tiled_kernel_f32out(x_ref, w_ref, b_ref, o_ref, *, compute_dtype):
    """Tiled K-reduction; f32 output doubles as the accumulator (no scratch)."""
    k = pl.program_id(2)

    @pl.when(k == 0)
    def _():
        o_ref[...] = jnp.broadcast_to(b_ref[...], o_ref.shape)

    x = x_ref[...].astype(compute_dtype)
    w = w_ref[...].astype(compute_dtype)
    o_ref[...] += jnp.dot(x, w, preferred_element_type=jnp.float32)


def _fc_tiled_kernel_acc(x_ref, w_ref, b_ref, o_ref, acc_ref, *, compute_dtype):
    """Tiled K-reduction with f32 VMEM accumulator (low-precision outputs)."""
    k = pl.program_id(2)

    @pl.when(k == 0)
    def _():
        acc_ref[...] = jnp.zeros_like(acc_ref)

    x = x_ref[...].astype(compute_dtype)
    w = w_ref[...].astype(compute_dtype)
    acc_ref[...] += jnp.dot(x, w, preferred_element_type=jnp.float32)

    @pl.when(k == pl.num_programs(2) - 1)
    def _():
        o_ref[...] = (acc_ref[...] + b_ref[...]).astype(o_ref.dtype)


# ------------------------------ wrapper --------------------------------------


def simple_fc_forward(x, w_t, b, *, out_features,
                      tm=512, tn=512, tk=1024,
                      compute_dtype=jnp.bfloat16, out_dtype=None,
                      force_tiled=False):
    """y = x @ weight.T + bias  (torch.nn.Linear semantics).

    x:   [B, IN]
    w_t: [Kp, Np]  pre-transposed / pre-padded weight from prepare_fc_params
    b:   [1, Np]   pre-padded f32 bias
    """
    B, IN = x.shape
    Kp, Np = w_t.shape
    assert Kp >= IN and Kp % 128 == 0 and Np % 128 == 0 and Np >= out_features
    out_dtype = out_dtype if out_dtype is not None else x.dtype

    Mp8 = _round_up(B, 8)

    # ---- single-block fast path for tiny problems (e.g. the toy 8x32x16) ----
    total_bytes = 4 * (Mp8 * Kp + Kp * Np + Mp8 * Np)
    if (not force_tiled) and total_bytes <= (4 << 20):
        x_p = x
        if (Mp8, Kp) != (B, IN):
            x_p = jnp.pad(x, ((0, Mp8 - B), (0, Kp - IN)))
        out_p = pl.pallas_call(
            functools.partial(_fc_onepass_kernel, compute_dtype=compute_dtype),
            out_shape=jax.ShapeDtypeStruct((Mp8, Np), out_dtype),
        )(x_p, w_t, b)
        return out_p[:B, :out_features]

    # ---------------------------- tiled GEMM path ----------------------------
    # N / K tiles: multiples of 128 that divide the (already 128-padded) extents.
    tn = min(tn, Np)
    while Np % tn != 0:
        tn -= 128
    tk = min(tk, Kp)
    while Kp % tk != 0:
        tk -= 128
    # M tile: clamp to the 8-padded batch, then pad M to a tile multiple.
    tm = min(tm, Mp8)
    Mp = _round_up(Mp8, tm)

    # Make sure at least one "parallel" axis has >=2 blocks so both v7x
    # TensorCores get work (harmless on single-TC v5e/v6e).
    if Mp // tm == 1 and Np // tn == 1 and Np >= 256:
        cand = (Np // 2) // 128 * 128
        while cand >= 128 and Np % cand != 0:
            cand -= 128
        if cand >= 128:
            tn = cand

    x_p = x
    if (Mp, Kp) != (B, IN):
        x_p = jnp.pad(x, ((0, Mp - B), (0, Kp - IN)))

    grid = (Mp // tm, Np // tn, Kp // tk)

    if jnp.dtype(out_dtype) == jnp.dtype(jnp.float32):
        kernel = functools.partial(_fc_tiled_kernel_f32out,
                                   compute_dtype=compute_dtype)
        scratch = []
    else:
        kernel = functools.partial(_fc_tiled_kernel_acc,
                                   compute_dtype=compute_dtype)
        scratch = [pltpu.VMEM((tm, tn), jnp.float32)]

    # VMEM budget: double-buffered x/w/out tiles + acc scratch, with headroom;
    # keep the cap v7x-safe (64 MiB physical per TC).
    est = (2 * (tm * tk * jnp.dtype(x.dtype).itemsize
                + tk * tn * jnp.dtype(w_t.dtype).itemsize
                + tm * tn * jnp.dtype(out_dtype).itemsize)
           + tm * tn * 4 + 2 * tn * 4)
    vmem_limit = int(min(max(2 * est, 32 << 20), 48 << 20))

    out_p = pl.pallas_call(
        kernel,
        out_shape=jax.ShapeDtypeStruct((Mp, Np), out_dtype),
        grid=grid,
        in_specs=[
            pl.BlockSpec((tm, tk), lambda i, j, k: (i, k)),   # x tile
            pl.BlockSpec((tk, tn), lambda i, j, k: (k, j)),   # weight tile [IN,OUT]
            pl.BlockSpec((1, tn), lambda i, j, k: (0, j)),    # bias tile
        ],
        out_specs=pl.BlockSpec((tm, tn), lambda i, j, k: (i, j)),
        scratch_shapes=scratch,
        compiler_params=pltpu.CompilerParams(
            dimension_semantics=("parallel", "parallel", "arbitrary"),
            vmem_limit_bytes=vmem_limit,
        ),
    )(x_p, w_t, b)

    return out_p[:B, :out_features]


# -------------------------------- test ---------------------------------------

if __name__ == "__main__":
    # Small shapes consistent with the module: batch=8, input_size=32, output_size=16
    batch, input_size, output_size = 8, 32, 16

    key = jax.random.PRNGKey(0)
    kx, kw, kb = jax.random.split(key, 3)

    x = jax.random.normal(kx, (batch, input_size), dtype=jnp.float32)
    # Deterministic init mimicking nn.Linear's uniform(-1/sqrt(in), 1/sqrt(in))
    bound = 1.0 / jnp.sqrt(jnp.float32(input_size))
    weight = jax.random.uniform(kw, (output_size, input_size),
                                dtype=jnp.float32, minval=-bound, maxval=bound)
    bias = jax.random.uniform(kb, (output_size,),
                              dtype=jnp.float32, minval=-bound, maxval=bound)

    ref_f32 = x @ weight.T + bias

    # 1) f32 params + f32 compute -> parity with torch f32 nn.Linear.
    #    (tiny shape takes the single-block fast path)
    w32, b32 = prepare_fc_params(weight, bias, param_dtype=jnp.float32)
    fwd_small = jax.jit(functools.partial(
        simple_fc_forward, out_features=output_size,
        compute_dtype=jnp.float32))
    out = fwd_small(x, w32, b32)
    jax.block_until_ready(out)
    assert out.shape == (batch, output_size)
    assert jnp.allclose(out, ref_f32, atol=1e-5, rtol=1e-5), float(
        jnp.max(jnp.abs(out - ref_f32)))

    # 2) bf16 params + bf16 compute, forced through the tiled K-reduction path.
    #    bf16 operand rounding is a deliberate precision trade-off; the
    #    reference is rounded identically and tolerance scales with sqrt(K).
    w16, b16 = prepare_fc_params(weight, bias, param_dtype=jnp.bfloat16)
    fwd_tiled = jax.jit(functools.partial(
        simple_fc_forward, out_features=output_size,
        compute_dtype=jnp.bfloat16, force_tiled=True))
    out_t = fwd_tiled(x, w16, b16)
    jax.block_until_ready(out_t)
    x_b = x.astype(jnp.bfloat16).astype(jnp.float32)
    w_b = weight.astype(jnp.bfloat16).astype(jnp.float32)
    ref_b = x_b @ w_b.T + bias
    tol = 1e-4 * max(1.0, float(jnp.sqrt(jnp.float32(input_size))))
    assert out_t.shape == (batch, output_size)
    assert jnp.allclose(out_t, ref_b, atol=tol, rtol=tol), float(
        jnp.max(jnp.abs(out_t - ref_b)))

    print("KERNEL_OK")
</pallas_src>

<mosaic_0001>
module attributes {stable_mosaic.version = 11 : i64} {
  func.func @_fc_onepass_kernel(%arg0: memref<8x128xf32, #tpu.memory_space<vmem>>, %arg1: memref<128x128xf32, #tpu.memory_space<vmem>>, %arg2: memref<1x128xf32, #tpu.memory_space<vmem>>, %arg3: memref<8x128xf32, #tpu.memory_space<vmem>>) attributes {dimension_semantics = [], scalar_prefetch = 0 : i64, scratch_operands = 0 : i64, tpu.core_type = #tpu.core_type<tc>} {
    %c0 = arith.constant 0 : index
    %c0_0 = arith.constant 0 : index
    %0 = vector.load %arg0[%c0, %c0_0] : memref<8x128xf32, #tpu.memory_space<vmem>>, vector<8x128xf32>
    %c0_1 = arith.constant 0 : index
    %c0_2 = arith.constant 0 : index
    %1 = vector.load %arg1[%c0_1, %c0_2] : memref<128x128xf32, #tpu.memory_space<vmem>>, vector<128x128xf32>
    %cst = arith.constant dense<0.000000e+00> : vector<8x128xf32>
    %2 = tpu.matmul %0, %1, %cst {dimension_numbers = #tpu.dot_dimension_numbers<[1], [0], [0], [1], [0, 0, 1, 1], [], []>} : vector<8x128xf32>, vector<128x128xf32>, vector<8x128xf32> -> vector<8x128xf32>
    %c0_3 = arith.constant 0 : index
    %c0_4 = arith.constant 0 : index
    %3 = vector.load %arg2[%c0_3, %c0_4] : memref<1x128xf32, #tpu.memory_space<vmem>>, vector<1x128xf32>
    %4 = vector.broadcast %3 : vector<1x128xf32> to vector<8x128xf32>
    %5 = arith.addf %2, %4 : vector<8x128xf32>
    %c0_5 = arith.constant 0 : index
    %c0_6 = arith.constant 0 : index
    %6 = vector.load %arg3[%c0_5, %c0_6] : memref<8x128xf32, #tpu.memory_space<vmem>>, vector<8x128xf32>
    tpu.vector_store %arg3[%c0_5, %c0_6], %5 {strides = array<i32>} : memref<8x128xf32, #tpu.memory_space<vmem>>, vector<8x128xf32>,
    return
  }
}

</mosaic_0001>

<bundles_post_ra>
// kernel: simple_fc_forward.1
= control target key start
LH: loop header
LB: loop body
LE: loop exit
PB: predicated region body
PF: predicated region fallthrough
CT: control target
= control target key end

     0   :  { %8 = vsyncpa [#allocation3], 0  ;;  %s183_s0 = inlined_call_operand.vmem [shape: f32[8,128], index: 0, kind: input, shape index: {}]   ;;  %s184_s1 = inlined_call_operand.hbm [shape: f32[128,128], index: 1, kind: input, shape index: {}]   ;;  %s185_s2 = inlined_call_operand.vmem [shape: f32[1,128], index: 2, kind: input, shape index: {}]   ;;  %s186_s3 = inlined_call_operand.hbm [shape: f32[8,128], index: 3, kind: output, shape index: {}]  }
   0x1   :  { %9 = vsyncpa [#allocation4], 0  ;;  %s16_s14 = sshll.u32 %s184_s1, 4  ;;  %s147_s15 = smov [#allocation2]   ;;  %s17_s14 = int_to_ptr.hbm [resolvable:$true] %s16_s14 }
   0x2   :  { %s18_s16 = sshll.u32 %s147_s15, 4  ;;  %s148_s17 = smov 128   ;;  %s19_s16 = int_to_ptr.vmem [resolvable:$true] %s18_s16 }
   0x3   :  { %s149_s18 = smov 8  }
   0x4   :  { %24 = dma.hbm_to_vmem [thread:$0]  %s17_s14, 2048, %s19_s16, [#allocation3], %s148_s17, %s148_s17, %s149_s18  }
   0x5   :  { %143 = dma.done.wait [#allocation3], 2048  }
   0x6   :  { %144 = vsyncadd [#allocation3], 4294965248  ;;  %v47_v0 = vld [vmem:[#allocation2 + $0x78] sm:$0xff]  ;;  %v46_v1 = vld [vmem:[#allocation2 + $0x70] sm:$0xff]  ;;  %s150_s22 = smov [#allocation5]   ;;  %s80_s26 = sshll.u32 %s186_s3, 4  ;;  %s81_s26 = int_to_ptr.hbm [resolvable:$true] %s80_s26 }
   0x7   :  { %52 = vmatpush.msra.mxu0 %v47_v0  ;;  %v45_v2 = vld [vmem:[#allocation2 + $0x68] sm:$0xff]  ;;  %v44_v3 = vld [vmem:[#allocation2 + $0x60] sm:$0xff]  ;;  %v43_v4 = vld [vmem:[#allocation2 + $0x58] sm:$0xff]  ;;  %s78_s23 = sshll.u32 %s150_s22, 4  ;;  %s79_s23 = int_to_ptr.vmem [resolvable:$true] %s78_s23 }
   0x8   :  { %v42_v5 = vld [vmem:[#allocation2 + $0x50] sm:$0xff]  ;;  %v41_v6 = vld [vmem:[#allocation2 + $0x48] sm:$0xff]  ;;  %v40_v7 = vld [vmem:[#allocation2 + $0x40] sm:$0xff] }
   0x9   :  { %53 = vmatpush.msra.mxu0 %v46_v1  ;;  %v39_v8 = vld [vmem:[#allocation2 + $0x38] sm:$0xff]  ;;  %v38_v9 = vld [vmem:[#allocation2 + $0x30] sm:$0xff]  ;;  %v37_v10 = vld [vmem:[#allocation2 + $0x28] sm:$0xff] }
   0xa   :  { %v36_v11 = vld [vmem:[#allocation2 + $0x20] sm:$0xff]  ;;  %v35_v12 = vld [vmem:[#allocation2 + $0x18] sm:$0xff]  ;;  %v34_v13 = vld [vmem:[#allocation2 + $0x10] sm:$0xff] }
   0xb   :  { %54 = vmatpush.msra.mxu0 %v45_v2  ;;  %v33_v14 = vld [vmem:[#allocation2 + $0x8] sm:$0xff]  ;;  %v32_v15 = vld [vmem:[#allocation2] sm:$0xff] }
   0xc   :  { %v31_v16 = vld [vmem:[%s183_s0] sm:$0xff] }
   0xd   :  { %55 = vmatpush.msra.mxu0 %v44_v3  ;;  %v94_v17 = vld [vmem:[%s185_s2] ss:$0 sm:$0xff] }
   0xf   :  { %56 = vmatpush.msra.mxu0 %v43_v4 }
  0x11   :  { %57 = vmatpush.msra.mxu0 %v42_v5 }
  0x13   :  { %58 = vmatpush.msra.mxu0 %v41_v6 }
  0x15   :  { %59 = vmatpush.msra.mxu0 %v40_v7 }
  0x17   :  { %60 = vmatpush.msra.mxu0 %v39_v8 }
  0x19   :  { %61 = vmatpush.msra.mxu0 %v38_v9 }
  0x1b   :  { %62 = vmatpush.msra.mxu0 %v37_v10 }
  0x1d   :  { %63 = vmatpush.msra.mxu0 %v36_v11 }
  0x1f   :  { %64 = vmatpush.msra.mxu0 %v35_v12 }
  0x21   :  { %65 = vmatpush.msra.mxu0 %v34_v13 }
  0x23   :  { %66 = vmatpush.msra.mxu0 %v33_v14 }
  0x25   :  { %67 = vmatpush.msra.mxu0 %v32_v15 }
  0x26   :  { %68 = vmatmul.f32.vlgmr.msra.gmra.mxu0 %v31_v16 }
  0xa3   :  { %v69_v18 = vpop.f32.mrf.mxu0 }
  0xa4   :  { %v70_v19 = vadd.f32 %v94_v17, %v69_v18 }
  0xa6   :  { %72 = vst [vmem:[#allocation5] sm:$0xff] %v70_v19 }
  0xa7   :  { %83 = dma.vmem_to_hbm [thread:$0]  %s79_s23, 128, %s81_s26, [#allocation4]  }
  0xa8   :  { %145 = dma.done.wait [#allocation4], 128  }
  0xa9   :  { %146 = vsyncadd [#allocation4], 4294967168 }
  0xaa   :  { %88 = vsyncpa [#allocation3], 1 }
  0xab   :  { %89 = vsyncpa [#allocation4], 1 }

</bundles_post_ra>
